<compile_context>
chip_gen: v5e
topology: v5e:2x2
jax: 0.10.0
libtpu: 0.0.40
codegen_flags: <defaults>
</compile_context>

<pallas_src>
import numpy as np
import jax
import jax.numpy as jnp
from jax.experimental import pallas as pl
from jax.experimental.pallas import tpu as pltpu

C_IN = 3
C_OUT = 8
H = 64
W = 64
PAD = 1
HP = H + 2 * PAD            # 66
WP = W + 2 * PAD            # 66
HWP = HP * WP               # 4356 = 34*128 + 4


def conv1x1_pad_bias_kernel(w_ref, b_ref, x_ref, o_ref):
    # w_ref: (C_OUT, C_IN), b_ref: (C_OUT, 1), x_ref: (C_IN, HWP), o_ref: (C_OUT, HWP)
    # Full fused result (conv + padding border + bias) in one matmul + broadcast add.
    o_ref[...] = (
        jnp.dot(w_ref[...], x_ref[...], preferred_element_type=jnp.float32)
        + b_ref[...]
    )


def conv1x1_pad_bias(xp_flat, weight2d, bias2d):
    """xp_flat: (C_IN, HWP) f32 zero-padded input, weight2d: (C_OUT, C_IN),
    bias2d: (C_OUT, 1) -> (C_OUT, HWP) f32 final (padded + biased) output."""
    hwp = xp_flat.shape[1]
    return pl.pallas_call(
        conv1x1_pad_bias_kernel,
        out_shape=jax.ShapeDtypeStruct((C_OUT, hwp), jnp.float32),
        # No grid: whole ~200 KiB working set is resident in VMEM in one step,
        # so no pipeline / double-buffer scaffolding.
        in_specs=[
            pl.BlockSpec(memory_space=pltpu.MemorySpace.VMEM),  # weight (8,3)
            pl.BlockSpec(memory_space=pltpu.MemorySpace.VMEM),  # bias   (8,1)
            pl.BlockSpec(memory_space=pltpu.MemorySpace.VMEM),  # x      (3,4356)
        ],
        out_specs=pl.BlockSpec(memory_space=pltpu.MemorySpace.VMEM),
        cost_estimate=pl.CostEstimate(
            flops=2 * C_OUT * C_IN * hwp,
            transcendentals=0,
            bytes_accessed=4 * (C_IN * hwp + C_OUT * hwp + C_OUT * C_IN + C_OUT),
        ),
    )(weight2d, bias2d, xp_flat)


def init_params(key):
    # Mirrors torch.nn.Conv2d(3, 8, 1) parameter shapes: weight (8,3,1,1), bias (8,)
    kw, kb = jax.random.split(key)
    fan_in = C_IN * 1 * 1
    bound = 1.0 / np.sqrt(fan_in)
    weight = jax.random.uniform(kw, (C_OUT, C_IN, 1, 1), jnp.float32, -bound, bound)
    bias = jax.random.uniform(kb, (C_OUT,), jnp.float32, -bound, bound)
    return weight, bias


def _forward_impl(x1, weight, bias, other):
    """Reproduces Model.forward:
        v1 = Conv2d(3, 8, 1, stride=1, padding=1)(x1)   # (1, 8, 66, 66)
        if other.shape == v1.shape: other = 0
        v2 = v1 + other
    """
    n, cin, h, w = x1.shape
    assert n == 1 and cin == C_IN and h == H and w == W

    x = x1[0].astype(jnp.float32)                                   # (3, 64, 64)
    # Zero-pad the (small) input; the 1x1 conv over the padded input directly
    # yields the padded conv output (border == bias after the in-kernel bias add).
    xp = jnp.pad(x, ((0, 0), (PAD, PAD), (PAD, PAD)))               # (3, 66, 66)
    xp_flat = xp.reshape(C_IN, HWP)                                 # (3, 4356)

    w2d = weight.reshape(C_OUT, C_IN).astype(jnp.float32)           # (8, 3)
    b2d = bias.reshape(C_OUT, 1).astype(jnp.float32)                # (8, 1)

    out_flat = conv1x1_pad_bias(xp_flat, w2d, b2d)                  # (8, 4356)
    v1 = out_flat.reshape(1, C_OUT, HP, WP)                         # (1, 8, 66, 66)

    # Trace-time (metadata-only) shape compare, mirroring np.array_equal on shapes:
    # if shapes match, the module replaces `other` with 0 -> skip the dead add.
    if tuple(other.shape) == tuple(v1.shape):
        return v1
    # TODO(synk): in the unequal-shape path PyTorch may raise on broadcast; here we
    # follow JAX broadcasting semantics instead.
    return v1 + other


# Single jitted graph: pad/cast/reshape fuse around the one pallas_call.
model_forward = jax.jit(_forward_impl)


if __name__ == "__main__":
    key = jax.random.PRNGKey(0)
    kx, kp, ko = jax.random.split(key, 3)

    x1 = jax.random.normal(kx, (1, C_IN, H, W), jnp.float32)
    weight, bias = init_params(kp)

    # `other` with the same shape as v1 -> module sets it to 0 (the non-erroring path).
    other = jax.random.normal(ko, (1, C_OUT, HP, WP), jnp.float32)

    out = model_forward(x1, weight, bias, other)
    jax.block_until_ready(out)

    # Sanity check against a pure-JAX reference of the 1x1 conv with padding=1.
    ref_core = jnp.einsum("oc,chw->ohw", weight.reshape(C_OUT, C_IN), x1[0]) \
        + bias[:, None, None]
    ref = jnp.broadcast_to(bias[:, None, None], (C_OUT, HP, WP))
    ref = ref.at[:, PAD:-PAD, PAD:-PAD].set(ref_core)[None]
    np.testing.assert_allclose(np.asarray(out), np.asarray(ref), rtol=1e-5, atol=1e-5)

    assert out.shape == (1, C_OUT, HP, WP)
    print("KERNEL_OK")
</pallas_src>

<mosaic_0001>
module attributes {stable_mosaic.version = 11 : i64} {
  func.func @conv1x1_pad_bias_kernel(%arg0: memref<8x3xf32, #tpu.memory_space<vmem>>, %arg1: memref<8x1xf32, #tpu.memory_space<vmem>>, %arg2: memref<3x4356xf32, #tpu.memory_space<vmem>>, %arg3: memref<8x4356xf32, #tpu.memory_space<vmem>>) attributes {dimension_semantics = [], scalar_prefetch = 0 : i64, scratch_operands = 0 : i64, tpu.core_type = #tpu.core_type<tc>} {
    %c0 = arith.constant 0 : index
    %c0_0 = arith.constant 0 : index
    %0 = vector.load %arg0[%c0, %c0_0] : memref<8x3xf32, #tpu.memory_space<vmem>>, vector<8x3xf32>
    %c0_1 = arith.constant 0 : index
    %c0_2 = arith.constant 0 : index
    %1 = vector.load %arg2[%c0_1, %c0_2] : memref<3x4356xf32, #tpu.memory_space<vmem>>, vector<3x4356xf32>
    %cst = arith.constant dense<0.000000e+00> : vector<8x4356xf32>
    %2 = tpu.matmul %0, %1, %cst {dimension_numbers = #tpu.dot_dimension_numbers<[1], [0], [0], [1], [0, 0, 1, 1], [], []>} : vector<8x3xf32>, vector<3x4356xf32>, vector<8x4356xf32> -> vector<8x4356xf32>
    %c0_3 = arith.constant 0 : index
    %c0_4 = arith.constant 0 : index
    %3 = vector.load %arg1[%c0_3, %c0_4] : memref<8x1xf32, #tpu.memory_space<vmem>>, vector<8x1xf32>
    %4 = vector.broadcast %3 : vector<8x1xf32> to vector<8x4356xf32>
    %5 = arith.addf %2, %4 : vector<8x4356xf32>
    %c0_5 = arith.constant 0 : index
    %c0_6 = arith.constant 0 : index
    %6 = vector.load %arg3[%c0_5, %c0_6] : memref<8x4356xf32, #tpu.memory_space<vmem>>, vector<8x4356xf32>
    tpu.vector_store %arg3[%c0_5, %c0_6], %5 {strides = array<i32>} : memref<8x4356xf32, #tpu.memory_space<vmem>>, vector<8x4356xf32>,
    return
  }
}

</mosaic_0001>

<bundles_post_ra>
// kernel: _forward_impl.1
= control target key start
LH: loop header
LB: loop body
LE: loop exit
PB: predicated region body
PF: predicated region fallthrough
CT: control target
= control target key end

     0   :  { %v1000_v2 = vmov 0   ;;  %vm117_vm0 = vcmask 1042432   ;;  %vm113_vm1 = vcmask 23552   ;;  %vm922_vm2 = vcmask 31744   ;;  %s1330_s2 = inlined_call_operand.vmem [shape: f32[3,4356], index: 2, kind: input, shape index: {}]   ;;  %s1331_s1 = inlined_call_operand.vmem [shape: f32[8,1], index: 1, kind: input, shape index: {}]   ;;  %s1332_s0 = inlined_call_operand.vmem [shape: f32[8,3], index: 0, kind: input, shape index: {}]   ;;  %s1333_s3 = inlined_call_operand.vmem [shape: f32[8,4356], index: 3, kind: output, shape index: {}]  }
   0x1   :  { %v16_v0 = vld [vmem:[%s1330_s2 + $0x8] sm:$0x77]  ;;  %v18_v1 = vld [vmem:[%s1330_s2 + $0x18] sm:$0x77]  ;;  %999 = vset.pattern.permute.xlu0 %v1000_v2  ;;  %v15_v3 = vld [vmem:[%s1330_s2] sm:$0x77] }
   0x2   :  { %59 = vst [vmem:[#allocation1 + $0x10] ss:$2 sm:$0xff] %v16_v0  ;;  %v17_v4 = vld [vmem:[%s1330_s2 + $0x10] sm:$0x77]  ;;  %v33_v5 = vld [vmem:[%s1331_s1] sm:$0xff] }
   0x3   :  { %63 = vst [vmem:[#allocation1 + $0x30] ss:$2 sm:$0xff] %v18_v1  ;;  %v20_v6 = vld [vmem:[%s1330_s2 + $0x28] sm:$0x77]  ;;  %36 = vperm.xlu0 %999, %v33_v5   ;;  %v1042_v7 = vld [vmem:[%s1332_s0] sm:$0xff] }
   0x4   :  { %57 = vst [vmem:[#allocation1] ss:$2 sm:$0xff] %v15_v3  ;;  %v19_v8 = vld [vmem:[%s1330_s2 + $0x20] sm:$0x77]  ;;  %v21_v10 = vld [vmem:[%s1330_s2 + $0x30] sm:$0x77] }
   0x5   :  { %61 = vst [vmem:[#allocation1 + $0x20] ss:$2 sm:$0xff] %v17_v4  ;;  %v22_v13 = vld [vmem:[%s1330_s2 + $0x38] sm:$0x77]  ;;  %v24_v19 = vld [vmem:[%s1330_s2 + $0x48] sm:$0x77] }
   0x6   :  { %v23_v20 = vld [vmem:[%s1330_s2 + $0x40] sm:$0x77]  ;;  %v25_v23 = vld [vmem:[%s1330_s2 + $0x50] sm:$0x77]  ;;  %v26_v26 = vld [vmem:[%s1330_s2 + $0x58] sm:$0x77] }
   0x7   :  { %v28_v31 = vld [vmem:[%s1330_s2 + $0x68] sm:$0x77]  ;;  %v27_v32 = vld [vmem:[%s1330_s2 + $0x60] sm:$0x77]  ;;  %v29_v35 = vld [vmem:[%s1330_s2 + $0x70] sm:$0x77] }
   0x8   :  { %v30_v38 = vld [vmem:[%s1330_s2 + $0x78] sm:$0x77]  ;;  %v32_v41 = vld [vmem:[%s1330_s2 + $0x88] sm:$0x7]  ;;  %v31_v44 = vld [vmem:[%s1330_s2 + $0x80] sm:$0x77] }
   0x9   :  { %v66_v9 = vld.sshfl [vmem:[#allocation1 + $0x10] sm:$0xff pattern:$0x75316420]  ;;  %v67_v11 = vld.sshfl [vmem:[#allocation1 + $0x18] sm:$0xff pattern:$0x75316420] }
   0xa   :  { %932 = vmatpush.msk.msra.mxu2 %vm117_vm0, %v66_v9  ;;  %v70_v12 = vld.sshfl [vmem:[#allocation1 + $0x30] sm:$0xff pattern:$0x75316420]  ;;  %73 = vst [vmem:[#allocation1 + $0x10] ss:$2 sm:$0xff] %v20_v6  ;;  %934 = vmatpush.msk.msra.mxu3 %vm117_vm0, %v67_v11 }
   0xb   :  { %933 = vmatmul.msk.f32.vlgmr.msra.gmra.mxu2 %vm113_vm1, %v1042_v7  ;;  %v64_v14 = vld.sshfl [vmem:[#allocation1] sm:$0xff pattern:$0x75316420]  ;;  %v65_v15 = vld.sshfl [vmem:[#allocation1 + $0x8] sm:$0xff pattern:$0x75316420]  ;;  %935 = vmatmul.msk.f32.vlgmr.msra.gmra.mxu3 %vm113_vm1, %v1042_v7 }
   0xc   :  { %940 = vmatpush.msk.msrb.mxu2 %vm117_vm0, %v70_v12  ;;  %928 = vmatpush.msk.msra.mxu0 %vm117_vm0, %v64_v14  ;;  %72 = vst [vmem:[#allocation1] ss:$2 sm:$0xff] %v19_v8  ;;  %v68_v16 = vld.sshfl [vmem:[#allocation1 + $0x20] sm:$0xff pattern:$0x75316420] }
   0xd   :  { %930 = vmatpush.msk.msra.mxu1 %vm117_vm0, %v65_v15  ;;  %929 = vmatmul.msk.f32.vlgmr.msra.gmra.mxu0 %vm113_vm1, %v1042_v7  ;;  %v69_v17 = vld.sshfl [vmem:[#allocation1 + $0x28] sm:$0xff pattern:$0x75316420]  ;;  %v71_v18 = vld.sshfl [vmem:[#allocation1 + $0x38] sm:$0xff pattern:$0x75316420] }
   0xe   :  { %931 = vmatmul.msk.f32.vlgmr.msra.gmra.mxu1 %vm113_vm1, %v1042_v7  ;;  %936 = vmatpush.msk.msrb.mxu0 %vm117_vm0, %v68_v16  ;;  %74 = vst [vmem:[#allocation1 + $0x20] ss:$2 sm:$0xff] %v21_v10 }
   0xf   :  { %938 = vmatpush.msk.msrb.mxu1 %vm117_vm0, %v69_v17  ;;  %75 = vst [vmem:[#allocation1 + $0x30] ss:$2 sm:$0xff] %v22_v13  ;;  %942 = vmatpush.msk.msrb.mxu3 %vm117_vm0, %v71_v18 }
  0x11   :  { %v78_v21 = vld.sshfl [vmem:[#allocation1 + $0x10] sm:$0xff pattern:$0x75316420]  ;;  %v79_v22 = vld.sshfl [vmem:[#allocation1 + $0x18] sm:$0xff pattern:$0x75316420] }
  0x12   :  { %948 = vmatpush.msk.msra.mxu2 %vm117_vm0, %v78_v21  ;;  %85 = vst [vmem:[#allocation1 + $0x10] ss:$2 sm:$0xff] %v24_v19  ;;  %950 = vmatpush.msk.msra.mxu3 %vm117_vm0, %v79_v22 }
  0x13   :  { %941 = vmatmul.msk.f32.vlgmr.msrb.gmra.mxu2 %vm113_vm1, %v1042_v7  ;;  %v76_v24 = vld.sshfl [vmem:[#allocation1] sm:$0xff pattern:$0x75316420]  ;;  %v77_v25 = vld.sshfl [vmem:[#allocation1 + $0x8] sm:$0xff pattern:$0x75316420]  ;;  %943 = vmatmul.msk.f32.vlgmr.msrb.gmra.mxu3 %vm113_vm1, %v1042_v7 }
  0x14   :  { %944 = vmatpush.msk.msra.mxu0 %vm117_vm0, %v76_v24  ;;  %84 = vst [vmem:[#allocation1] ss:$2 sm:$0xff] %v23_v20  ;;  %946 = vmatpush.msk.msra.mxu1 %vm117_vm0, %v77_v25 }
  0x15   :  { %937 = vmatmul.msk.f32.vlgmr.msrb.gmra.mxu0 %vm113_vm1, %v1042_v7  ;;  %v80_v27 = vld.sshfl [vmem:[#allocation1 + $0x20] sm:$0xff pattern:$0x75316420]  ;;  %v81_v28 = vld.sshfl [vmem:[#allocation1 + $0x28] sm:$0xff pattern:$0x75316420] }
  0x16   :  { %939 = vmatmul.msk.f32.vlgmr.msrb.gmra.mxu1 %vm113_vm1, %v1042_v7  ;;  %v82_v29 = vld.sshfl [vmem:[#allocation1 + $0x30] sm:$0xff pattern:$0x75316420]  ;;  %952 = vmatpush.msk.msrb.mxu0 %vm117_vm0, %v80_v27  ;;  %86 = vst [vmem:[#allocation1 + $0x20] ss:$2 sm:$0xff] %v25_v23 }
  0x17   :  { %956 = vmatpush.msk.msrb.mxu2 %vm117_vm0, %v82_v29  ;;  %954 = vmatpush.msk.msrb.mxu1 %vm117_vm0, %v81_v28  ;;  %v83_v30 = vld.sshfl [vmem:[#allocation1 + $0x38] sm:$0xff pattern:$0x75316420] }
  0x18   :  { %87 = vst [vmem:[#allocation1 + $0x30] ss:$2 sm:$0xff] %v26_v26  ;;  %958 = vmatpush.msk.msrb.mxu3 %vm117_vm0, %v83_v30 }
  0x19   :  { %v90_v33 = vld.sshfl [vmem:[#allocation1 + $0x10] sm:$0xff pattern:$0x75316420]  ;;  %v91_v34 = vld.sshfl [vmem:[#allocation1 + $0x18] sm:$0xff pattern:$0x75316420] }
  0x1a   :  { %97 = vst [vmem:[#allocation1 + $0x10] ss:$2 sm:$0xff] %v28_v31 }
  0x1b   :  { %949 = vmatmul.msk.f32.vlgmr.msra.gmra.mxu2 %vm113_vm1, %v1042_v7  ;;  %951 = vmatmul.msk.f32.vlgmr.msra.gmra.mxu3 %vm113_vm1, %v1042_v7  ;;  %v88_v36 = vld.sshfl [vmem:[#allocation1] sm:$0xff pattern:$0x75316420]  ;;  %v89_v37 = vld.sshfl [vmem:[#allocation1 + $0x8] sm:$0xff pattern:$0x75316420] }
  0x1c   :  { %964 = vmatpush.msk.msra.mxu2 %vm117_vm0, %v90_v33  ;;  %96 = vst [vmem:[#allocation1] ss:$2 sm:$0xff] %v27_v32  ;;  %966 = vmatpush.msk.msra.mxu3 %vm117_vm0, %v91_v34 }
  0x1d   :  { %945 = vmatmul.msk.f32.vlgmr.msra.gmra.mxu0 %vm113_vm1, %v1042_v7  ;;  %v92_v39 = vld.sshfl [vmem:[#allocation1 + $0x20] sm:$0xff pattern:$0x75316420]  ;;  %v93_v40 = vld.sshfl [vmem:[#allocation1 + $0x28] sm:$0xff pattern:$0x75316420] }
  0x1e   :  { %947 = vmatmul.msk.f32.vlgmr.msra.gmra.mxu1 %vm113_vm1, %v1042_v7  ;;  %960 = vmatpush.msk.msra.mxu0 %vm117_vm0, %v88_v36  ;;  %98 = vst [vmem:[#allocation1 + $0x20] ss:$2 sm:$0xff] %v29_v35 }
  0x1f   :  { %962 = vmatpush.msk.msra.mxu1 %vm117_vm0, %v89_v37  ;;  %v94_v42 = vld.sshfl [vmem:[#allocation1 + $0x30] sm:$0xff pattern:$0x75316420]  ;;  %v95_v43 = vld.sshfl [vmem:[#allocation1 + $0x38] sm:$0xff pattern:$0x75316420] }
  0x20   :  { %99 = vst [vmem:[#allocation1 + $0x30] ss:$2 sm:$0xff] %v30_v38 }
  0x21   :  { %v102_v45 = vld.sshfl [vmem:[#allocation1 + $0x10] sm:$0xff pattern:$0x75316420]  ;;  %v103_v46 = vld.sshfl [vmem:[#allocation1 + $0x18] sm:$0xff pattern:$0x75316420] }
  0x22   :  { %109 = vst [vmem:[#allocation1 + $0x10] ss:$2 sm:$0xff] %v32_v41 }
  0x23   :  { %957 = vmatmul.msk.f32.vlgmr.msrb.gmra.mxu2 %vm113_vm1, %v1042_v7  ;;  %959 = vmatmul.msk.f32.vlgmr.msrb.gmra.mxu3 %vm113_vm1, %v1042_v7  ;;  %v100_v47 = vld.sshfl [vmem:[#allocation1] sm:$0xff pattern:$0x75316420]  ;;  %v101_v48 = vld.sshfl [vmem:[#allocation1 + $0x8] sm:$0xff pattern:$0x75316420] }
  0x24   :  { %972 = vmatpush.msk.msrb.mxu2 %vm117_vm0, %v94_v42  ;;  %974 = vmatpush.msk.msrb.mxu3 %vm117_vm0, %v95_v43  ;;  %108 = vst [vmem:[#allocation1] ss:$2 sm:$0xff] %v31_v44 }
  0x25   :  { %953 = vmatmul.msk.f32.vlgmr.msrb.gmra.mxu0 %vm113_vm1, %v1042_v7  ;;  %v104_v51 = vld.sshfl [vmem:[#allocation1 + $0x20] sm:$0xff pattern:$0x75316420]  ;;  %v105_v52 = vld.sshfl [vmem:[#allocation1 + $0x28] sm:$0xff pattern:$0x75316420] }
  0x26   :  { %955 = vmatmul.msk.f32.vlgmr.msrb.gmra.mxu1 %vm113_vm1, %v1042_v7  ;;  %968 = vmatpush.msk.msrb.mxu0 %vm117_vm0, %v92_v39 }
  0x27   :  { %970 = vmatpush.msk.msrb.mxu1 %vm117_vm0, %v93_v40  ;;  %v106_v49 = vld.sshfl [vmem:[#allocation1 + $0x30] sm:$0xff pattern:$0x75316420]  ;;  %v107_v50 = vld.sshfl [vmem:[#allocation1 + $0x38] sm:$0xff pattern:$0x75316420] }
  0x29   :  { %v112_v53 = vld.sshfl [vmem:[#allocation1 + $0x10] sm:$0xff pattern:$0x75316420] }
  0x2b   :  { %965 = vmatmul.msk.f32.vlgmr.msra.gmra.mxu2 %vm113_vm1, %v1042_v7  ;;  %967 = vmatmul.msk.f32.vlgmr.msra.gmra.mxu3 %vm113_vm1, %v1042_v7  ;;  %v110_v54 = vld.sshfl [vmem:[#allocation1] sm:$0xff pattern:$0x75316420]  ;;  %v111_v55 = vld.sshfl [vmem:[#allocation1 + $0x8] sm:$0xff pattern:$0x75316420] }
  0x2c   :  { %980 = vmatpush.msk.msra.mxu2 %vm117_vm0, %v102_v45  ;;  %982 = vmatpush.msk.msra.mxu3 %vm117_vm0, %v103_v46 }
  0x2d   :  { %961 = vmatmul.msk.f32.vlgmr.msra.gmra.mxu0 %vm113_vm1, %v1042_v7 }
  0x2e   :  { %963 = vmatmul.msk.f32.vlgmr.msra.gmra.mxu1 %vm113_vm1, %v1042_v7  ;;  %976 = vmatpush.msk.msra.mxu0 %vm117_vm0, %v100_v47 }
  0x2f   :  { %978 = vmatpush.msk.msra.mxu1 %vm117_vm0, %v101_v48 }
  0x33   :  { %973 = vmatmul.msk.f32.vlgmr.msrb.gmra.mxu2 %vm113_vm1, %v1042_v7  ;;  %975 = vmatmul.msk.f32.vlgmr.msrb.gmra.mxu3 %vm113_vm1, %v1042_v7 }
  0x34   :  { %988 = vmatpush.msk.msrb.mxu2 %vm117_vm0, %v106_v49  ;;  %990 = vmatpush.msk.msrb.mxu3 %vm117_vm0, %v107_v50 }
  0x35   :  { %969 = vmatmul.msk.f32.vlgmr.msrb.gmra.mxu0 %vm113_vm1, %v1042_v7 }
  0x36   :  { %971 = vmatmul.msk.f32.vlgmr.msrb.gmra.mxu1 %vm113_vm1, %v1042_v7  ;;  %984 = vmatpush.msk.msrb.mxu0 %vm117_vm0, %v104_v51 }
  0x37   :  { %986 = vmatpush.msk.msrb.mxu1 %vm117_vm0, %v105_v52 }
  0x3b   :  { %981 = vmatmul.msk.f32.vlgmr.msra.gmra.mxu2 %vm113_vm1, %v1042_v7  ;;  %983 = vmatmul.msk.f32.vlgmr.msra.gmra.mxu3 %vm113_vm1, %v1042_v7 }
  0x3c   :  { %996 = vmatpush.msk.msra.mxu2 %vm117_vm0, %v112_v53 }
  0x3d   :  { %977 = vmatmul.msk.f32.vlgmr.msra.gmra.mxu0 %vm113_vm1, %v1042_v7 }
  0x3e   :  { %979 = vmatmul.msk.f32.vlgmr.msra.gmra.mxu1 %vm113_vm1, %v1042_v7  ;;  %992 = vmatpush.msk.msra.mxu0 %vm117_vm0, %v110_v54 }
  0x3f   :  { %994 = vmatpush.msk.msra.mxu1 %vm117_vm0, %v111_v55 }
  0x43   :  { %989 = vmatmul.msk.f32.vlgmr.msrb.gmra.mxu2 %vm113_vm1, %v1042_v7  ;;  %991 = vmatmul.msk.f32.vlgmr.msrb.gmra.mxu3 %vm113_vm1, %v1042_v7 }
  0x45   :  { %985 = vmatmul.msk.f32.vlgmr.msrb.gmra.mxu0 %vm113_vm1, %v1042_v7 }
  0x46   :  { %987 = vmatmul.msk.f32.vlgmr.msrb.gmra.mxu1 %vm113_vm1, %v1042_v7 }
  0x4b   :  { %997 = vmatmul.msk.f32.vlgmr.msra.gmra.mxu2 %vm113_vm1, %v1042_v7 }
  0x4d   :  { %993 = vmatmul.msk.f32.vlgmr.msra.gmra.mxu0 %vm113_vm1, %v1042_v7 }
  0x4e   :  { %995 = vmatmul.msk.f32.vlgmr.msra.gmra.mxu1 %vm113_vm1, %v1042_v7 }
  0x75   :  { %v1188_v56 = vpop.permute.xlu0 %36 }
  0x8a   :  { %v205_v57 = vpop.f32.mrf.mxu0 }
  0x8b   :  { %v206_v58 = vadd.f32 %v205_v57, %v1188_v56  ;;  %v225_v59 = vpop.f32.mrf.mxu1 }
  0x8c   :  { %v226_v60 = vadd.f32 %v225_v59, %v1188_v56 }
  0x8d   :  { %888 = vst [vmem:[%s1333_s3] sm:$0xff] %v206_v58 }
  0x8e   :  { %889 = vst [vmem:[%s1333_s3 + $0x8] sm:$0xff] %v226_v60  ;;  %v245_v61 = vpop.f32.mrf.mxu2  ;;  %v265_v62 = vpop.f32.mrf.mxu3 }
  0x8f   :  { %v246_v63 = vadd.f32 %v245_v61, %v1188_v56  ;;  %v266_v0 = vadd.f32 %v265_v62, %v1188_v56 }
  0x91   :  { %890 = vst [vmem:[%s1333_s3 + $0x10] sm:$0xff] %v246_v63 }
  0x92   :  { %891 = vst [vmem:[%s1333_s3 + $0x18] sm:$0xff] %v266_v0  ;;  %v285_v1 = vpop.f32.mrf.mxu0 }
  0x93   :  { %v286_v2 = vadd.f32 %v285_v1, %v1188_v56  ;;  %v305_v3 = vpop.f32.mrf.mxu1 }
  0x94   :  { %v306_v4 = vadd.f32 %v305_v3, %v1188_v56 }
  0x95   :  { %892 = vst [vmem:[%s1333_s3 + $0x20] sm:$0xff] %v286_v2 }
  0x96   :  { %893 = vst [vmem:[%s1333_s3 + $0x28] sm:$0xff] %v306_v4  ;;  %v325_v5 = vpop.f32.mrf.mxu2  ;;  %v345_v6 = vpop.f32.mrf.mxu3 }
  0x97   :  { %v326_v7 = vadd.f32 %v325_v5, %v1188_v56  ;;  %v346_v8 = vadd.f32 %v345_v6, %v1188_v56 }
  0x99   :  { %894 = vst [vmem:[%s1333_s3 + $0x30] sm:$0xff] %v326_v7 }
  0x9a   :  { %895 = vst [vmem:[%s1333_s3 + $0x38] sm:$0xff] %v346_v8  ;;  %v365_v9 = vpop.f32.mrf.mxu0 }
  0x9b   :  { %v366_v10 = vadd.f32 %v365_v9, %v1188_v56  ;;  %v385_v11 = vpop.f32.mrf.mxu1 }
  0x9c   :  { %v386_v12 = vadd.f32 %v385_v11, %v1188_v56 }
  0x9d   :  { %896 = vst [vmem:[%s1333_s3 + $0x40] sm:$0xff] %v366_v10 }
  0x9e   :  { %897 = vst [vmem:[%s1333_s3 + $0x48] sm:$0xff] %v386_v12  ;;  %v405_v13 = vpop.f32.mrf.mxu2  ;;  %v425_v14 = vpop.f32.mrf.mxu3 }
  0x9f   :  { %v406_v15 = vadd.f32 %v405_v13, %v1188_v56  ;;  %v426_v16 = vadd.f32 %v425_v14, %v1188_v56 }
  0xa1   :  { %898 = vst [vmem:[%s1333_s3 + $0x50] sm:$0xff] %v406_v15 }
  0xa2   :  { %899 = vst [vmem:[%s1333_s3 + $0x58] sm:$0xff] %v426_v16  ;;  %v445_v17 = vpop.f32.mrf.mxu0 }
  0xa3   :  { %v446_v18 = vadd.f32 %v445_v17, %v1188_v56  ;;  %v465_v19 = vpop.f32.mrf.mxu1 }
  0xa4   :  { %v466_v20 = vadd.f32 %v465_v19, %v1188_v56 }
  0xa5   :  { %900 = vst [vmem:[%s1333_s3 + $0x60] sm:$0xff] %v446_v18 }
  0xa6   :  { %901 = vst [vmem:[%s1333_s3 + $0x68] sm:$0xff] %v466_v20  ;;  %v485_v21 = vpop.f32.mrf.mxu2  ;;  %v505_v22 = vpop.f32.mrf.mxu3 }
  0xa7   :  { %v486_v23 = vadd.f32 %v485_v21, %v1188_v56  ;;  %v506_v24 = vadd.f32 %v505_v22, %v1188_v56 }
  0xa9   :  { %902 = vst [vmem:[%s1333_s3 + $0x70] sm:$0xff] %v486_v23 }
  0xaa   :  { %903 = vst [vmem:[%s1333_s3 + $0x78] sm:$0xff] %v506_v24  ;;  %v525_v25 = vpop.f32.mrf.mxu0 }
  0xab   :  { %v526_v26 = vadd.f32 %v525_v25, %v1188_v56  ;;  %v545_v27 = vpop.f32.mrf.mxu1 }
  0xac   :  { %v546_v28 = vadd.f32 %v545_v27, %v1188_v56 }
  0xad   :  { %904 = vst [vmem:[%s1333_s3 + $0x80] sm:$0xff] %v526_v26 }
  0xae   :  { %905 = vst [vmem:[%s1333_s3 + $0x88] sm:$0xff] %v546_v28  ;;  %v565_v29 = vpop.f32.mrf.mxu2  ;;  %v585_v30 = vpop.f32.mrf.mxu3 }
  0xaf   :  { %v566_v31 = vadd.f32 %v565_v29, %v1188_v56  ;;  %v586_v32 = vadd.f32 %v585_v30, %v1188_v56 }
  0xb1   :  { %906 = vst [vmem:[%s1333_s3 + $0x90] sm:$0xff] %v566_v31 }
  0xb2   :  { %907 = vst [vmem:[%s1333_s3 + $0x98] sm:$0xff] %v586_v32  ;;  %v605_v33 = vpop.f32.mrf.mxu0 }
  0xb3   :  { %v606_v34 = vadd.f32 %v605_v33, %v1188_v56  ;;  %v625_v35 = vpop.f32.mrf.mxu1 }
  0xb4   :  { %v626_v36 = vadd.f32 %v625_v35, %v1188_v56 }
  0xb5   :  { %908 = vst [vmem:[%s1333_s3 + $0xa0] sm:$0xff] %v606_v34 }
  0xb6   :  { %909 = vst [vmem:[%s1333_s3 + $0xa8] sm:$0xff] %v626_v36  ;;  %v645_v37 = vpop.f32.mrf.mxu2  ;;  %v665_v38 = vpop.f32.mrf.mxu3 }
  0xb7   :  { %v646_v39 = vadd.f32 %v645_v37, %v1188_v56  ;;  %v666_v40 = vadd.f32 %v665_v38, %v1188_v56 }
  0xb9   :  { %910 = vst [vmem:[%s1333_s3 + $0xb0] sm:$0xff] %v646_v39 }
  0xba   :  { %911 = vst [vmem:[%s1333_s3 + $0xb8] sm:$0xff] %v666_v40  ;;  %v685_v41 = vpop.f32.mrf.mxu0 }
  0xbb   :  { %v686_v42 = vadd.f32 %v685_v41, %v1188_v56  ;;  %v705_v43 = vpop.f32.mrf.mxu1 }
  0xbc   :  { %v706_v44 = vadd.f32 %v705_v43, %v1188_v56 }
  0xbd   :  { %912 = vst [vmem:[%s1333_s3 + $0xc0] sm:$0xff] %v686_v42 }
  0xbe   :  { %913 = vst [vmem:[%s1333_s3 + $0xc8] sm:$0xff] %v706_v44  ;;  %v725_v45 = vpop.f32.mrf.mxu2  ;;  %v745_v46 = vpop.f32.mrf.mxu3 }
  0xbf   :  { %v726_v47 = vadd.f32 %v725_v45, %v1188_v56  ;;  %v746_v48 = vadd.f32 %v745_v46, %v1188_v56 }
  0xc1   :  { %914 = vst [vmem:[%s1333_s3 + $0xd0] sm:$0xff] %v726_v47 }
  0xc2   :  { %915 = vst [vmem:[%s1333_s3 + $0xd8] sm:$0xff] %v746_v48  ;;  %v765_v49 = vpop.f32.mrf.mxu0 }
  0xc3   :  { %v766_v50 = vadd.f32 %v765_v49, %v1188_v56  ;;  %v785_v51 = vpop.f32.mrf.mxu1 }
  0xc4   :  { %v786_v52 = vadd.f32 %v785_v51, %v1188_v56 }
  0xc5   :  { %916 = vst [vmem:[%s1333_s3 + $0xe0] sm:$0xff] %v766_v50 }
  0xc6   :  { %917 = vst [vmem:[%s1333_s3 + $0xe8] sm:$0xff] %v786_v52  ;;  %v805_v53 = vpop.f32.mrf.mxu2  ;;  %v825_v54 = vpop.f32.mrf.mxu3 }
  0xc7   :  { %v806_v55 = vadd.f32 %v805_v53, %v1188_v56  ;;  %v826_v57 = vadd.f32 %v825_v54, %v1188_v56 }
  0xc9   :  { %918 = vst [vmem:[%s1333_s3 + $0xf0] sm:$0xff] %v806_v55 }
  0xca   :  { %919 = vst [vmem:[%s1333_s3 + $0xf8] sm:$0xff] %v826_v57  ;;  %v845_v58 = vpop.f32.mrf.mxu0 }
  0xcb   :  { %v846_v59 = vadd.f32 %v845_v58, %v1188_v56  ;;  %v865_v60 = vpop.f32.mrf.mxu1 }
  0xcc   :  { %v866_v61 = vadd.f32 %v865_v60, %v1188_v56 }
  0xcd   :  { %920 = vst [vmem:[%s1333_s3 + $0x100] sm:$0xff] %v846_v59 }
  0xce   :  { %921 = vst [vmem:[%s1333_s3 + $0x108] sm:$0xff] %v866_v61  ;;  %v885_v62 = vpop.f32.mrf.mxu2 }
  0xcf   :  { %v886_v63 = vadd.f32 %v885_v62, %v1188_v56 }
  0xd1   :  { %923 = vst.msk [vmem:[%s1333_s3 + $0x110] sm:$0xff] %vm922_vm2, %v886_v63 }

</bundles_post_ra>
